<compile_context>
chip_gen: v7x
topology: tpu7x:2x2x1
jax: 0.10.0
libtpu: 0.0.40
codegen_flags: <defaults>
</compile_context>

<pallas_src>
import functools
import math

import jax
import jax.numpy as jnp
import numpy as np
from jax.experimental import pallas as pl
from jax.experimental.pallas import tpu as pltpu

MIN_NORM_SQ = 1e-30   # clamp on squared norms  -> min norm 1e-15
ATANH_EPS = 1e-6      # clamp inside artanh domain (>= f32 ulp near 1.0)
PROJ_EPS = 1e-5       # ball projection margin
DEN_EPS = 1e-15       # mobius_add denominator clamp


def _make_euc_encoder_kernel(c, sqrt_c, inv_sqrt_c, maxnorm):
    """Kernel factory: curvature-derived constants are baked in as Python floats."""

    def kernel(hbsq_ref,                  # SMEM (2,): ||expmap0(b1)||^2, ||expmap0(b2)||^2
               z_ref,                     # (TR, P) padded input rows (f32)
               w1_ref, hb1_ref,           # PoincareLinear 1: (P, P) [mxu dtype], (1, P) f32
               w2_ref, hb2_ref,           # PoincareLinear 2
               wm1_ref, bm1_ref,          # node_mlp linear 1: (P, Hp), (1, Hp)
               wm2_ref, bm2_ref,          # node_mlp linear 2: (Hp, Po), (1, Po)
               o_ref):                    # (TR, Po) f32

        def rownorm(x):                   # (R, F) -> (R, 1)
            return jnp.sqrt(jnp.maximum(jnp.sum(x * x, axis=-1, keepdims=True), MIN_NORM_SQ))

        def artanh(x):
            x = jnp.clip(x, -1.0 + ATANH_EPS, 1.0 - ATANH_EPS)
            return 0.5 * jnp.log((1.0 + x) / (1.0 - x))

        def poincare_linear(h, n_h, w_ref, hb_ref, y2):
            # logmap0(h) = (artanh(sqrt_c*||h||)/(sqrt_c*||h||)) * h.  The per-row scale
            # commutes through the matmul, so feed `h` to the MXU and fold the scale after.
            sn_h = sqrt_c * n_h
            scale_log = artanh(sn_h) / sn_h                          # (R,1)
            raw = jnp.dot(h.astype(w_ref.dtype), w_ref[...],
                          preferred_element_type=jnp.float32)        # (R,P) MXU
            n_raw = rownorm(raw)                                     # reduction 1
            n_mv = scale_log * n_raw                                 # ||logmap0(h) @ W||
            sn_mv = sqrt_c * n_mv
            t = jnp.tanh(sn_mv)                                      # EUP
            # expmap0(mv) = (tanh(sn_mv)/sn_mv) * mv; combined per-row factor applied to raw.
            fac = scale_log * (t / sn_mv)                            # (R,1)
            n_res = t * inv_sqrt_c                                   # analytic ||expmap0(mv)||
            proj1 = jnp.where(n_res > maxnorm, maxnorm / n_res, 1.0)
            x = raw * (fac * proj1)                                  # proj(expmap0(mv))
            n_x = jnp.minimum(n_res, maxnorm)                        # analytic ||x||

            # mobius_add(x, hb), hb = expmap0(b) (host-hoisted), y2 = ||hb||^2 (host-hoisted).
            x2 = n_x * n_x
            xy = jnp.sum(x * hb_ref[...], axis=-1, keepdims=True)    # reduction 2
            a = 1.0 + 2.0 * c * xy
            den = jnp.maximum(a + (c * c) * x2 * y2, DEN_EPS)        # (R,1)
            inv = pl.reciprocal(den, approx=True)                    # EUP
            inv = inv * (2.0 - den * inv)                            # Newton step -> f32 accurate
            madd = ((a + c * y2) * inv) * x + ((1.0 - c * x2) * inv) * hb_ref[...]
            n_m = rownorm(madd)                                      # reduction 3
            proj2 = jnp.where(n_m > maxnorm, maxnorm / n_m, 1.0)
            return madd * proj2, jnp.minimum(n_m, maxnorm)           # carry norm forward

        h = z_ref[...].astype(jnp.float32)
        n_h = rownorm(h)                                             # only input-norm reduction
        # PoincareMLP: dropout(p=0.1) is identity at inference; no resnet / layernorm.
        h, n_h = poincare_linear(h, n_h, w1_ref, hb1_ref, hbsq_ref[0])
        h, n_h = poincare_linear(h, n_h, w2_ref, hb2_ref, hbsq_ref[1])

        # e = manifold.logmap0(h), reusing the carried norm (no extra reduction).
        sn = sqrt_c * n_h
        e = (artanh(sn) / sn) * h

        # node_mlp: Linear -> ReLU -> Linear, all lane-dense 128-wide MXU matmuls.
        hid = jnp.dot(e.astype(wm1_ref.dtype), wm1_ref[...],
                      preferred_element_type=jnp.float32) + bm1_ref[...]
        hid = jnp.maximum(hid, 0.0)
        out = jnp.dot(hid.astype(wm2_ref.dtype), wm2_ref[...],
                      preferred_element_type=jnp.float32) + bm2_ref[...]
        o_ref[...] = out.astype(o_ref.dtype)

    return kernel


def _round_up(x, m):
    return (x + m - 1) // m * m


def _vmem_limit_bytes(TR, P, Hp, Po, w_itemsize):
    f32 = 4
    io = 2 * TR * (P + Po) * f32                                 # double-buffered in/out tiles
    weights = (2 * P * P + P * Hp + Hp * Po) * w_itemsize + (2 * P + Hp + Po) * f32
    temps = 12 * TR * max(P, Hp) * f32                           # generous live-temporary budget
    budget = io + weights + temps + (2 << 20)                    # + 2 MiB slack
    return int(min(112 * 2 ** 20, max(budget, 32 * 2 ** 20)))


@functools.partial(jax.jit,
                   static_argnames=("curvature", "row_tile", "mxu_dtype", "unpad_output"))
def euc_encoder_forward(z, params, *, curvature=1.0, row_tile=512,
                        mxu_dtype=jnp.float32, unpad_output=True):
    """z: (B, N, euc_channels) float32 points on the Poincare ball."""
    B, N, E = z.shape
    W1, b1 = params["W1"], params["b1"]          # torch nn.Linear layout: (out, in), (out,)
    W2, b2 = params["W2"], params["b2"]
    Wm1, bm1 = params["Wm1"], params["bm1"]      # (4E, E), (4E,)
    Wm2, bm2 = params["Wm2"], params["bm2"]      # (out_c, 4E), (out_c,)
    out_c = Wm2.shape[0]
    Hd = Wm1.shape[0]

    # Curvature-derived Python constants (baked into the kernel body).
    c = float(curvature)
    sqrt_c = math.sqrt(c)
    inv_sqrt_c = 1.0 / sqrt_c
    maxnorm = (1.0 - PROJ_EPS) / sqrt_c

    # Lane-dense padding (exact: zero lanes contribute 0 to every norm / dot product).
    P = _round_up(E, 128)
    Hp = _round_up(Hd, 128)
    Po = _round_up(out_c, 128)

    # Row tiling: multiple of 8, and at least 2 tiles whenever rows allow so the "parallel"
    # grid axis gives both v7x TensorCores work; row_tile caps the per-tile VMEM working set.
    R = B * N
    R8 = _round_up(max(R, 1), 8)
    n_tiles = max(1, -(-R8 // row_tile))
    if R8 >= 16:
        n_tiles = max(n_tiles, 2)
    TR = _round_up(-(-R8 // n_tiles), 8)
    Rp = _round_up(R8, TR)

    zf = jnp.pad(z.reshape(R, E).astype(jnp.float32), ((0, Rp - R), (0, P - E)))

    def pad_w(W, rows, cols):                    # (out, in) -> (in, out), zero-padded
        Wt = jnp.asarray(W, jnp.float32).T
        Wt = jnp.pad(Wt, ((0, rows - Wt.shape[0]), (0, cols - Wt.shape[1])))
        return Wt.astype(mxu_dtype)

    def pad_b(b, cols):
        b = jnp.asarray(b, jnp.float32).reshape(1, -1)
        return jnp.pad(b, ((0, 0), (0, cols - b.shape[1])))

    # Hoisted (host-side) hyperbolic biases expmap0(b) and their squared norms.
    def expmap0_host(u):
        n = jnp.sqrt(jnp.maximum(jnp.sum(u * u, axis=-1, keepdims=True), MIN_NORM_SQ))
        return (jnp.tanh(sqrt_c * n) / (sqrt_c * n)) * u

    hb1 = pad_b(expmap0_host(jnp.asarray(b1, jnp.float32)), P)
    hb2 = pad_b(expmap0_host(jnp.asarray(b2, jnp.float32)), P)
    hb_sq = jnp.stack([jnp.sum(hb1 * hb1), jnp.sum(hb2 * hb2)]).astype(jnp.float32)

    row_spec = pl.BlockSpec((TR, P), lambda r: (r, 0))
    out_spec = pl.BlockSpec((TR, Po), lambda r: (r, 0))

    def resident(shape):                         # grid-invariant weight/bias block
        return pl.BlockSpec(shape, lambda r: (0, 0))

    kernel = _make_euc_encoder_kernel(c, sqrt_c, inv_sqrt_c, maxnorm)

    out = pl.pallas_call(
        kernel,
        out_shape=jax.ShapeDtypeStruct((Rp, Po), jnp.float32),
        grid=(Rp // TR,),
        in_specs=[
            pl.BlockSpec(memory_space=pltpu.MemorySpace.SMEM),   # [||hb1||^2, ||hb2||^2]
            row_spec,                                            # z rows
            resident((P, P)), resident((1, P)),                  # PoincareLinear 1
            resident((P, P)), resident((1, P)),                  # PoincareLinear 2
            resident((P, Hp)), resident((1, Hp)),                # node_mlp linear 1
            resident((Hp, Po)), resident((1, Po)),               # node_mlp linear 2
        ],
        out_specs=out_spec,
        compiler_params=pltpu.CompilerParams(
            dimension_semantics=("parallel",),
            vmem_limit_bytes=_vmem_limit_bytes(TR, P, Hp, Po, jnp.dtype(mxu_dtype).itemsize)),
    )(hb_sq, zf,
      pad_w(W1, P, P), hb1,
      pad_w(W2, P, P), hb2,
      pad_w(Wm1, P, Hp), pad_b(bm1, Hp),
      pad_w(Wm2, Hp, Po), pad_b(bm2, Po))

    if unpad_output:
        return out[:R, :out_c].reshape(B, N, out_c)
    # Fusion-friendly option: hand the lane-dense padded slab to the downstream consumer and
    # let it slice, avoiding an extra HBM round trip for the column un-pad.
    return out


def reference_forward(z, params, curvature=1.0):
    """Pure-JAX reference of the assumed EucEncoder forward (inference mode)."""
    c = jnp.float32(curvature)
    sqrt_c = jnp.sqrt(c)
    hp = jax.lax.Precision.HIGHEST

    def norm(x):
        return jnp.sqrt(jnp.maximum(jnp.sum(x * x, axis=-1, keepdims=True), MIN_NORM_SQ))

    def artanh(x):
        x = jnp.clip(x, -1.0 + ATANH_EPS, 1.0 - ATANH_EPS)
        return 0.5 * jnp.log((1.0 + x) / (1.0 - x))

    def logmap0(y):
        n = norm(y)
        return (artanh(sqrt_c * n) / (sqrt_c * n)) * y

    def expmap0(u):
        n = norm(u)
        return (jnp.tanh(sqrt_c * n) / (sqrt_c * n)) * u

    def proj(x):
        n = norm(x)
        maxn = (1.0 - PROJ_EPS) / sqrt_c
        return x * jnp.where(n > maxn, maxn / n, 1.0)

    def mobius_add(x, y):
        x2 = jnp.sum(x * x, axis=-1, keepdims=True)
        y2 = jnp.sum(y * y, axis=-1, keepdims=True)
        xy = jnp.sum(x * y, axis=-1, keepdims=True)
        num = (1.0 + 2.0 * c * xy + c * y2) * x + (1.0 - c * x2) * y
        den = 1.0 + 2.0 * c * xy + c * c * x2 * y2
        return num / jnp.maximum(den, DEN_EPS)

    def plinear(h, W, b):
        mv = jnp.matmul(logmap0(h), W.T, precision=hp)
        res = proj(expmap0(mv))
        return proj(mobius_add(res, expmap0(b)[None]))

    h = plinear(z, params["W1"], params["b1"])
    h = plinear(h, params["W2"], params["b2"])
    e = logmap0(h)
    hid = jax.nn.relu(jnp.matmul(e, params["Wm1"].T, precision=hp) + params["bm1"])
    return jnp.matmul(hid, params["Wm2"].T, precision=hp) + params["bm2"]


if __name__ == "__main__":
    B, N = 2, 8
    in_channels = 32          # stored by the module but unused in forward
    euc_channels = 32
    out_channels = 32
    E = euc_channels
    Hd = 4 * E

    key = jax.random.PRNGKey(0)
    ks = jax.random.split(key, 10)

    # Points on the Poincare ball (c=1): expmap0 of small tangent vectors.
    u = 0.1 * jax.random.normal(ks[0], (B, N, E), jnp.float32)
    un = jnp.sqrt(jnp.maximum(jnp.sum(u * u, axis=-1, keepdims=True), MIN_NORM_SQ))
    z = jnp.tanh(un) / un * u

    s1 = 1.0 / np.sqrt(E)
    s2 = 1.0 / np.sqrt(Hd)
    params = {
        "W1": s1 * jax.random.normal(ks[1], (E, E), jnp.float32),
        "b1": 0.01 * jax.random.normal(ks[2], (E,), jnp.float32),
        "W2": s1 * jax.random.normal(ks[3], (E, E), jnp.float32),
        "b2": 0.01 * jax.random.normal(ks[4], (E,), jnp.float32),
        "Wm1": s1 * jax.random.normal(ks[5], (Hd, E), jnp.float32),
        "bm1": 0.01 * jax.random.normal(ks[6], (Hd,), jnp.float32),
        "Wm2": s2 * jax.random.normal(ks[7], (out_channels, Hd), jnp.float32),
        "bm2": 0.01 * jax.random.normal(ks[8], (out_channels,), jnp.float32),
    }

    out = euc_encoder_forward(z, params)
    out = jax.block_until_ready(out)

    ref = reference_forward(z, params)
    np.testing.assert_allclose(np.asarray(out), np.asarray(ref), rtol=1e-4, atol=1e-4)

    assert out.shape == (B, N, out_channels)
    print("KERNEL_OK")
</pallas_src>

<mosaic_0001>
module attributes {stable_mosaic.version = 11 : i64} {
  func.func @kernel(%arg0: i32, %arg1: memref<2xf32, #tpu.memory_space<smem>>, %arg2: memref<8x128xf32, #tpu.memory_space<vmem>>, %arg3: memref<128x128xf32, #tpu.memory_space<vmem>>, %arg4: memref<1x128xf32, #tpu.memory_space<vmem>>, %arg5: memref<128x128xf32, #tpu.memory_space<vmem>>, %arg6: memref<1x128xf32, #tpu.memory_space<vmem>>, %arg7: memref<128x128xf32, #tpu.memory_space<vmem>>, %arg8: memref<1x128xf32, #tpu.memory_space<vmem>>, %arg9: memref<128x128xf32, #tpu.memory_space<vmem>>, %arg10: memref<1x128xf32, #tpu.memory_space<vmem>>, %arg11: memref<8x128xf32, #tpu.memory_space<vmem>>) attributes {dimension_semantics = [#tpu.dimension_semantics<parallel>], iteration_bounds = array<i64: 2>, scalar_prefetch = 0 : i64, scratch_operands = 0 : i64, tpu.core_type = #tpu.core_type<tc>, window_params = [{transform_indices = @transform_0, window_bounds = array<i64: 2>}, {transform_indices = @transform_1, window_bounds = array<i64: 8, 128>}, {pipeline_mode = #tpu.pipeline_mode<synchronous>, transform_indices = @transform_2, window_bounds = array<i64: 128, 128>}, {pipeline_mode = #tpu.pipeline_mode<synchronous>, transform_indices = @transform_3, window_bounds = array<i64: 1, 128>}, {pipeline_mode = #tpu.pipeline_mode<synchronous>, transform_indices = @transform_4, window_bounds = array<i64: 128, 128>}, {pipeline_mode = #tpu.pipeline_mode<synchronous>, transform_indices = @transform_5, window_bounds = array<i64: 1, 128>}, {pipeline_mode = #tpu.pipeline_mode<synchronous>, transform_indices = @transform_6, window_bounds = array<i64: 128, 128>}, {pipeline_mode = #tpu.pipeline_mode<synchronous>, transform_indices = @transform_7, window_bounds = array<i64: 1, 128>}, {pipeline_mode = #tpu.pipeline_mode<synchronous>, transform_indices = @transform_8, window_bounds = array<i64: 128, 128>}, {pipeline_mode = #tpu.pipeline_mode<synchronous>, transform_indices = @transform_9, window_bounds = array<i64: 1, 128>}, {transform_indices = @transform_10, window_bounds = array<i64: 8, 128>}]} {
    %c0 = arith.constant 0 : index
    %c0_0 = arith.constant 0 : index
    %0 = vector.load %arg2[%c0, %c0_0] : memref<8x128xf32, #tpu.memory_space<vmem>>, vector<8x128xf32>
    %1 = arith.mulf %0, %0 : vector<8x128xf32>
    %cst = arith.constant dense<0.000000e+00> : vector<8xf32>
    %2 = vector.multi_reduction <add>, %1, %cst [1] : vector<8x128xf32> to vector<8xf32>
    %3 = vector.shape_cast %2 : vector<8xf32> to vector<8x1xf32>
    %cst_1 = arith.constant 1.000000e-30 : f32
    %4 = vector.broadcast %cst_1 : f32 to vector<8x1xf32>
    %5 = arith.maximumf %3, %4 : vector<8x1xf32>
    %6 = math.sqrt %5 : vector<8x1xf32>
    %c0_2 = arith.constant 0 : index
    %7 = memref.load %arg1[%c0_2] : memref<2xf32, #tpu.memory_space<smem>>
    %cst_3 = arith.constant 1.000000e+00 : f32
    %8 = vector.broadcast %cst_3 : f32 to vector<8x1xf32>
    %9 = arith.mulf %8, %6 : vector<8x1xf32>
    %cst_4 = arith.constant -0.999998986 : f32
    %cst_5 = arith.constant 0.999998986 : f32
    %10 = vector.broadcast %cst_4 : f32 to vector<8x1xf32>
    %11 = arith.maximumf %10, %9 : vector<8x1xf32>
    %12 = vector.broadcast %cst_5 : f32 to vector<8x1xf32>
    %13 = arith.minimumf %12, %11 : vector<8x1xf32>
    %cst_6 = arith.constant 1.000000e+00 : f32
    %14 = vector.broadcast %cst_6 : f32 to vector<8x1xf32>
    %15 = arith.addf %14, %13 : vector<8x1xf32>
    %cst_7 = arith.constant 1.000000e+00 : f32
    %16 = vector.broadcast %cst_7 : f32 to vector<8x1xf32>
    %17 = arith.subf %16, %13 : vector<8x1xf32>
    %18 = arith.divf %15, %17 : vector<8x1xf32>
    %19 = math.log %18 : vector<8x1xf32>
    %cst_8 = arith.constant 5.000000e-01 : f32
    %20 = vector.broadcast %cst_8 : f32 to vector<8x1xf32>
    %21 = arith.mulf %20, %19 : vector<8x1xf32>
    %22 = arith.divf %21, %9 : vector<8x1xf32>
    %c0_9 = arith.constant 0 : index
    %c0_10 = arith.constant 0 : index
    %23 = vector.load %arg3[%c0_9, %c0_10] : memref<128x128xf32, #tpu.memory_space<vmem>>, vector<128x128xf32>
    %cst_11 = arith.constant dense<0.000000e+00> : vector<8x128xf32>
    %24 = tpu.matmul %0, %23, %cst_11 {dimension_numbers = #tpu.dot_dimension_numbers<[1], [0], [0], [1], [0, 0, 1, 1], [], []>} : vector<8x128xf32>, vector<128x128xf32>, vector<8x128xf32> -> vector<8x128xf32>
    %25 = arith.mulf %24, %24 : vector<8x128xf32>
    %cst_12 = arith.constant dense<0.000000e+00> : vector<8xf32>
    %26 = vector.multi_reduction <add>, %25, %cst_12 [1] : vector<8x128xf32> to vector<8xf32>
    %27 = vector.shape_cast %26 : vector<8xf32> to vector<8x1xf32>
    %cst_13 = arith.constant 1.000000e-30 : f32
    %28 = vector.broadcast %cst_13 : f32 to vector<8x1xf32>
    %29 = arith.maximumf %27, %28 : vector<8x1xf32>
    %30 = math.sqrt %29 : vector<8x1xf32>
    %31 = arith.mulf %22, %30 : vector<8x1xf32>
    %cst_14 = arith.constant 1.000000e+00 : f32
    %32 = vector.broadcast %cst_14 : f32 to vector<8x1xf32>
    %33 = arith.mulf %32, %31 : vector<8x1xf32>
    %34 = math.tanh %33 : vector<8x1xf32>
    %35 = arith.divf %34, %33 : vector<8x1xf32>
    %36 = arith.mulf %22, %35 : vector<8x1xf32>
    %cst_15 = arith.constant 1.000000e+00 : f32
    %37 = vector.broadcast %cst_15 : f32 to vector<8x1xf32>
    %38 = arith.mulf %34, %37 : vector<8x1xf32>
    %cst_16 = arith.constant 0.999989986 : f32
    %39 = vector.broadcast %cst_16 : f32 to vector<8x1xf32>
    %40 = arith.cmpf ogt, %38, %39 : vector<8x1xf32>
    %cst_17 = arith.constant 0.999989986 : f32
    %41 = vector.broadcast %cst_17 : f32 to vector<8x1xf32>
    %42 = arith.divf %41, %38 : vector<8x1xf32>
    %cst_18 = arith.constant 1.000000e+00 : f32
    %43 = vector.broadcast %cst_18 : f32 to vector<8x1xf32>
    %44 = arith.select %40, %42, %43 : vector<8x1xi1>, vector<8x1xf32>
    %45 = arith.mulf %36, %44 : vector<8x1xf32>
    %46 = vector.broadcast %45 : vector<8x1xf32> to vector<8x128xf32>
    %47 = arith.mulf %24, %46 : vector<8x128xf32>
    %cst_19 = arith.constant 0.999989986 : f32
    %48 = vector.broadcast %cst_19 : f32 to vector<8x1xf32>
    %49 = arith.minimumf %38, %48 : vector<8x1xf32>
    %50 = arith.mulf %49, %49 : vector<8x1xf32>
    %c0_20 = arith.constant 0 : index
    %c0_21 = arith.constant 0 : index
    %51 = vector.load %arg4[%c0_20, %c0_21] : memref<1x128xf32, #tpu.memory_space<vmem>>, vector<1x128xf32>
    %52 = vector.broadcast %51 : vector<1x128xf32> to vector<8x128xf32>
    %53 = arith.mulf %47, %52 : vector<8x128xf32>
    %cst_22 = arith.constant dense<0.000000e+00> : vector<8xf32>
    %54 = vector.multi_reduction <add>, %53, %cst_22 [1] : vector<8x128xf32> to vector<8xf32>
    %55 = vector.shape_cast %54 : vector<8xf32> to vector<8x1xf32>
    %cst_23 = arith.constant 2.000000e+00 : f32
    %56 = vector.broadcast %cst_23 : f32 to vector<8x1xf32>
    %57 = arith.mulf %56, %55 : vector<8x1xf32>
    %cst_24 = arith.constant 1.000000e+00 : f32
    %58 = vector.broadcast %cst_24 : f32 to vector<8x1xf32>
    %59 = arith.addf %58, %57 : vector<8x1xf32>
    %cst_25 = arith.constant 1.000000e+00 : f32
    %60 = vector.broadcast %cst_25 : f32 to vector<8x1xf32>
    %61 = arith.mulf %60, %50 : vector<8x1xf32>
    %62 = vector.broadcast %7 : f32 to vector<8x1xf32>
    %63 = arith.mulf %61, %62 : vector<8x1xf32>
    %64 = arith.addf %59, %63 : vector<8x1xf32>
    %cst_26 = arith.constant 1.000000e-15 : f32
    %65 = vector.broadcast %cst_26 : f32 to vector<8x1xf32>
    %66 = arith.maximumf %64, %65 : vector<8x1xf32>
    %67 = tpu.reciprocal %66 {approx = true} : vector<8x1xf32> -> vector<8x1xf32>
    %68 = arith.mulf %66, %67 : vector<8x1xf32>
    %cst_27 = arith.constant 2.000000e+00 : f32
    %69 = vector.broadcast %cst_27 : f32 to vector<8x1xf32>
    %70 = arith.subf %69, %68 : vector<8x1xf32>
    %71 = arith.mulf %67, %70 : vector<8x1xf32>
    %cst_28 = arith.constant 1.000000e+00 : f32
    %72 = arith.mulf %cst_28, %7 : f32
    %73 = vector.broadcast %72 : f32 to vector<8x1xf32>
    %74 = arith.addf %59, %73 : vector<8x1xf32>
    %75 = arith.mulf %74, %71 : vector<8x1xf32>
    %76 = vector.broadcast %75 : vector<8x1xf32> to vector<8x128xf32>
    %77 = arith.mulf %76, %47 : vector<8x128xf32>
    %cst_29 = arith.constant 1.000000e+00 : f32
    %78 = vector.broadcast %cst_29 : f32 to vector<8x1xf32>
    %79 = arith.mulf %78, %50 : vector<8x1xf32>
    %cst_30 = arith.constant 1.000000e+00 : f32
    %80 = vector.broadcast %cst_30 : f32 to vector<8x1xf32>
    %81 = arith.subf %80, %79 : vector<8x1xf32>
    %82 = arith.mulf %81, %71 : vector<8x1xf32>
    %c0_31 = arith.constant 0 : index
    %c0_32 = arith.constant 0 : index
    %83 = vector.load %arg4[%c0_31, %c0_32] : memref<1x128xf32, #tpu.memory_space<vmem>>, vector<1x128xf32>
    %84 = vector.broadcast %82 : vector<8x1xf32> to vector<8x128xf32>
    %85 = vector.broadcast %83 : vector<1x128xf32> to vector<8x128xf32>
    %86 = arith.mulf %84, %85 : vector<8x128xf32>
    %87 = arith.addf %77, %86 : vector<8x128xf32>
    %88 = arith.mulf %87, %87 : vector<8x128xf32>
    %cst_33 = arith.constant dense<0.000000e+00> : vector<8xf32>
    %89 = vector.multi_reduction <add>, %88, %cst_33 [1] : vector<8x128xf32> to vector<8xf32>
    %90 = vector.shape_cast %89 : vector<8xf32> to vector<8x1xf32>
    %cst_34 = arith.constant 1.000000e-30 : f32
    %91 = vector.broadcast %cst_34 : f32 to vector<8x1xf32>
    %92 = arith.maximumf %90, %91 : vector<8x1xf32>
    %93 = math.sqrt %92 : vector<8x1xf32>
    %cst_35 = arith.constant 0.999989986 : f32
    %94 = vector.broadcast %cst_35 : f32 to vector<8x1xf32>
    %95 = arith.cmpf ogt, %93, %94 : vector<8x1xf32>
    %cst_36 = arith.constant 0.999989986 : f32
    %96 = vector.broadcast %cst_36 : f32 to vector<8x1xf32>
    %97 = arith.divf %96, %93 : vector<8x1xf32>
    %cst_37 = arith.constant 1.000000e+00 : f32
    %98 = vector.broadcast %cst_37 : f32 to vector<8x1xf32>
    %99 = arith.select %95, %97, %98 : vector<8x1xi1>, vector<8x1xf32>
    %100 = vector.broadcast %99 : vector<8x1xf32> to vector<8x128xf32>
    %101 = arith.mulf %87, %100 : vector<8x128xf32>
    %cst_38 = arith.constant 0.999989986 : f32
    %102 = vector.broadcast %cst_38 : f32 to vector<8x1xf32>
    %103 = arith.minimumf %93, %102 : vector<8x1xf32>
    %c1 = arith.constant 1 : index
    %104 = memref.load %arg1[%c1] : memref<2xf32, #tpu.memory_space<smem>>
    %cst_39 = arith.constant 1.000000e+00 : f32
    %105 = vector.broadcast %cst_39 : f32 to vector<8x1xf32>
    %106 = arith.mulf %105, %103 : vector<8x1xf32>
    %cst_40 = arith.constant -0.999998986 : f32
    %cst_41 = arith.constant 0.999998986 : f32
    %107 = vector.broadcast %cst_40 : f32 to vector<8x1xf32>
    %108 = arith.maximumf %107, %106 : vector<8x1xf32>
    %109 = vector.broadcast %cst_41 : f32 to vector<8x1xf32>
    %110 = arith.minimumf %109, %108 : vector<8x1xf32>
    %cst_42 = arith.constant 1.000000e+00 : f32
    %111 = vector.broadcast %cst_42 : f32 to vector<8x1xf32>
    %112 = arith.addf %111, %110 : vector<8x1xf32>
    %cst_43 = arith.constant 1.000000e+00 : f32
    %113 = vector.broadcast %cst_43 : f32 to vector<8x1xf32>
    %114 = arith.subf %113, %110 : vector<8x1xf32>
    %115 = arith.divf %112, %114 : vector<8x1xf32>
    %116 = math.log %115 : vector<8x1xf32>
    %cst_44 = arith.constant 5.000000e-01 : f32
    %117 = vector.broadcast %cst_44 : f32 to vector<8x1xf32>
    %118 = arith.mulf %117, %116 : vector<8x1xf32>
    %119 = arith.divf %118, %106 : vector<8x1xf32>
    %c0_45 = arith.constant 0 : index
    %c0_46 = arith.constant 0 : index
    %120 = vector.load %arg5[%c0_45, %c0_46] : memref<128x128xf32, #tpu.memory_space<vmem>>, vector<128x128xf32>
    %cst_47 = arith.constant dense<0.000000e+00> : vector<8x128xf32>
    %121 = tpu.matmul %101, %120, %cst_47 {dimension_numbers = #tpu.dot_dimension_numbers<[1], [0], [0], [1], [0, 0, 1, 1], [], []>} : vector<8x128xf32>, vector<128x128xf32>, vector<8x128xf32> -> vector<8x128xf32>
    %122 = arith.mulf %121, %121 : vector<8x128xf32>
    %cst_48 = arith.constant dense<0.000000e+00> : vector<8xf32>
    %123 = vector.multi_reduction <add>, %122, %cst_48 [1] : vector<8x128xf32> to vector<8xf32>
    %124 = vector.shape_cast %123 : vector<8xf32> to vector<8x1xf32>
    %cst_49 = arith.constant 1.000000e-30 : f32
    %125 = vector.broadcast %cst_49 : f32 to vector<8x1xf32>
    %126 = arith.maximumf %124, %125 : vector<8x1xf32>
    %127 = math.sqrt %126 : vector<8x1xf32>
    %128 = arith.mulf %119, %127 : vector<8x1xf32>
    %cst_50 = arith.constant 1.000000e+00 : f32
    %129 = vector.broadcast %cst_50 : f32 to vector<8x1xf32>
    %130 = arith.mulf %129, %128 : vector<8x1xf32>
    %131 = math.tanh %130 : vector<8x1xf32>
    %132 = arith.divf %131, %130 : vector<8x1xf32>
    %133 = arith.mulf %119, %132 : vector<8x1xf32>
    %cst_51 = arith.constant 1.000000e+00 : f32
    %134 = vector.broadcast %cst_51 : f32 to vector<8x1xf32>
    %135 = arith.mulf %131, %134 : vector<8x1xf32>
    %cst_52 = arith.constant 0.999989986 : f32
    %136 = vector.broadcast %cst_52 : f32 to vector<8x1xf32>
    %137 = arith.cmpf ogt, %135, %136 : vector<8x1xf32>
    %cst_53 = arith.constant 0.999989986 : f32
    %138 = vector.broadcast %cst_53 : f32 to vector<8x1xf32>
    %139 = arith.divf %138, %135 : vector<8x1xf32>
    %cst_54 = arith.constant 1.000000e+00 : f32
    %140 = vector.broadcast %cst_54 : f32 to vector<8x1xf32>
    %141 = arith.select %137, %139, %140 : vector<8x1xi1>, vector<8x1xf32>
    %142 = arith.mulf %133, %141 : vector<8x1xf32>
    %143 = vector.broadcast %142 : vector<8x1xf32> to vector<8x128xf32>
    %144 = arith.mulf %121, %143 : vector<8x128xf32>
    %cst_55 = arith.constant 0.999989986 : f32
    %145 = vector.broadcast %cst_55 : f32 to vector<8x1xf32>
    %146 = arith.minimumf %135, %145 : vector<8x1xf32>
    %147 = arith.mulf %146, %146 : vector<8x1xf32>
    %c0_56 = arith.constant 0 : index
    %c0_57 = arith.constant 0 : index
    %148 = vector.load %arg6[%c0_56, %c0_57] : memref<1x128xf32, #tpu.memory_space<vmem>>, vector<1x128xf32>
    %149 = vector.broadcast %148 : vector<1x128xf32> to vector<8x128xf32>
    %150 = arith.mulf %144, %149 : vector<8x128xf32>
    %cst_58 = arith.constant dense<0.000000e+00> : vector<8xf32>
    %151 = vector.multi_reduction <add>, %150, %cst_58 [1] : vector<8x128xf32> to vector<8xf32>
    %152 = vector.shape_cast %151 : vector<8xf32> to vector<8x1xf32>
    %cst_59 = arith.constant 2.000000e+00 : f32
    %153 = vector.broadcast %cst_59 : f32 to vector<8x1xf32>
    %154 = arith.mulf %153, %152 : vector<8x1xf32>
    %cst_60 = arith.constant 1.000000e+00 : f32
    %155 = vector.broadcast %cst_60 : f32 to vector<8x1xf32>
    %156 = arith.addf %155, %154 : vector<8x1xf32>
    %cst_61 = arith.constant 1.000000e+00 : f32
    %157 = vector.broadcast %cst_61 : f32 to vector<8x1xf32>
    %158 = arith.mulf %157, %147 : vector<8x1xf32>
    %159 = vector.broadcast %104 : f32 to vector<8x1xf32>
    %160 = arith.mulf %158, %159 : vector<8x1xf32>
    %161 = arith.addf %156, %160 : vector<8x1xf32>
    %cst_62 = arith.constant 1.000000e-15 : f32
    %162 = vector.broadcast %cst_62 : f32 to vector<8x1xf32>
    %163 = arith.maximumf %161, %162 : vector<8x1xf32>
    %164 = tpu.reciprocal %163 {approx = true} : vector<8x1xf32> -> vector<8x1xf32>
    %165 = arith.mulf %163, %164 : vector<8x1xf32>
    %cst_63 = arith.constant 2.000000e+00 : f32
    %166 = vector.broadcast %cst_63 : f32 to vector<8x1xf32>
    %167 = arith.subf %166, %165 : vector<8x1xf32>
    %168 = arith.mulf %164, %167 : vector<8x1xf32>
    %cst_64 = arith.constant 1.000000e+00 : f32
    %169 = arith.mulf %cst_64, %104 : f32
    %170 = vector.broadcast %169 : f32 to vector<8x1xf32>
    %171 = arith.addf %156, %170 : vector<8x1xf32>
    %172 = arith.mulf %171, %168 : vector<8x1xf32>
    %173 = vector.broadcast %172 : vector<8x1xf32> to vector<8x128xf32>
    %174 = arith.mulf %173, %144 : vector<8x128xf32>
    %cst_65 = arith.constant 1.000000e+00 : f32
    %175 = vector.broadcast %cst_65 : f32 to vector<8x1xf32>
    %176 = arith.mulf %175, %147 : vector<8x1xf32>
    %cst_66 = arith.constant 1.000000e+00 : f32
    %177 = vector.broadcast %cst_66 : f32 to vector<8x1xf32>
    %178 = arith.subf %177, %176 : vector<8x1xf32>
    %179 = arith.mulf %178, %168 : vector<8x1xf32>
    %c0_67 = arith.constant 0 : index
    %c0_68 = arith.constant 0 : index
    %180 = vector.load %arg6[%c0_67, %c0_68] : memref<1x128xf32, #tpu.memory_space<vmem>>, vector<1x128xf32>
    %181 = vector.broadcast %179 : vector<8x1xf32> to vector<8x128xf32>
    %182 = vector.broadcast %180 : vector<1x128xf32> to vector<8x128xf32>
    %183 = arith.mulf %181, %182 : vector<8x128xf32>
    %184 = arith.addf %174, %183 : vector<8x128xf32>
    %185 = arith.mulf %184, %184 : vector<8x128xf32>
    %cst_69 = arith.constant dense<0.000000e+00> : vector<8xf32>
    %186 = vector.multi_reduction <add>, %185, %cst_69 [1] : vector<8x128xf32> to vector<8xf32>
    %187 = vector.shape_cast %186 : vector<8xf32> to vector<8x1xf32>
    %cst_70 = arith.constant 1.000000e-30 : f32
    %188 = vector.broadcast %cst_70 : f32 to vector<8x1xf32>
    %189 = arith.maximumf %187, %188 : vector<8x1xf32>
    %190 = math.sqrt %189 : vector<8x1xf32>
    %cst_71 = arith.constant 0.999989986 : f32
    %191 = vector.broadcast %cst_71 : f32 to vector<8x1xf32>
    %192 = arith.cmpf ogt, %190, %191 : vector<8x1xf32>
    %cst_72 = arith.constant 0.999989986 : f32
    %193 = vector.broadcast %cst_72 : f32 to vector<8x1xf32>
    %194 = arith.divf %193, %190 : vector<8x1xf32>
    %cst_73 = arith.constant 1.000000e+00 : f32
    %195 = vector.broadcast %cst_73 : f32 to vector<8x1xf32>
    %196 = arith.select %192, %194, %195 : vector<8x1xi1>, vector<8x1xf32>
    %197 = vector.broadcast %196 : vector<8x1xf32> to vector<8x128xf32>
    %198 = arith.mulf %184, %197 : vector<8x128xf32>
    %cst_74 = arith.constant 0.999989986 : f32
    %199 = vector.broadcast %cst_74 : f32 to vector<8x1xf32>
    %200 = arith.minimumf %190, %199 : vector<8x1xf32>
    %cst_75 = arith.constant 1.000000e+00 : f32
    %201 = vector.broadcast %cst_75 : f32 to vector<8x1xf32>
    %202 = arith.mulf %201, %200 : vector<8x1xf32>
    %cst_76 = arith.constant -0.999998986 : f32
    %cst_77 = arith.constant 0.999998986 : f32
    %203 = vector.broadcast %cst_76 : f32 to vector<8x1xf32>
    %204 = arith.maximumf %203, %202 : vector<8x1xf32>
    %205 = vector.broadcast %cst_77 : f32 to vector<8x1xf32>
    %206 = arith.minimumf %205, %204 : vector<8x1xf32>
    %cst_78 = arith.constant 1.000000e+00 : f32
    %207 = vector.broadcast %cst_78 : f32 to vector<8x1xf32>
    %208 = arith.addf %207, %206 : vector<8x1xf32>
    %cst_79 = arith.constant 1.000000e+00 : f32
    %209 = vector.broadcast %cst_79 : f32 to vector<8x1xf32>
    %210 = arith.subf %209, %206 : vector<8x1xf32>
    %211 = arith.divf %208, %210 : vector<8x1xf32>
    %212 = math.log %211 : vector<8x1xf32>
    %cst_80 = arith.constant 5.000000e-01 : f32
    %213 = vector.broadcast %cst_80 : f32 to vector<8x1xf32>
    %214 = arith.mulf %213, %212 : vector<8x1xf32>
    %215 = arith.divf %214, %202 : vector<8x1xf32>
    %216 = vector.broadcast %215 : vector<8x1xf32> to vector<8x128xf32>
    %217 = arith.mulf %216, %198 : vector<8x128xf32>
    %c0_81 = arith.constant 0 : index
    %c0_82 = arith.constant 0 : index
    %218 = vector.load %arg7[%c0_81, %c0_82] : memref<128x128xf32, #tpu.memory_space<vmem>>, vector<128x128xf32>
    %cst_83 = arith.constant dense<0.000000e+00> : vector<8x128xf32>
    %219 = tpu.matmul %217, %218, %cst_83 {dimension_numbers = #tpu.dot_dimension_numbers<[1], [0], [0], [1], [0, 0, 1, 1], [], []>} : vector<8x128xf32>, vector<128x128xf32>, vector<8x128xf32> -> vector<8x128xf32>
    %c0_84 = arith.constant 0 : index
    %c0_85 = arith.constant 0 : index
    %220 = vector.load %arg8[%c0_84, %c0_85] : memref<1x128xf32, #tpu.memory_space<vmem>>, vector<1x128xf32>
    %221 = vector.broadcast %220 : vector<1x128xf32> to vector<8x128xf32>
    %222 = arith.addf %219, %221 : vector<8x128xf32>
    %cst_86 = arith.constant 0.000000e+00 : f32
    %223 = vector.broadcast %cst_86 : f32 to vector<8x128xf32>
    %224 = arith.maximumf %222, %223 : vector<8x128xf32>
    %c0_87 = arith.constant 0 : index
    %c0_88 = arith.constant 0 : index
    %225 = vector.load %arg9[%c0_87, %c0_88] : memref<128x128xf32, #tpu.memory_space<vmem>>, vector<128x128xf32>
    %cst_89 = arith.constant dense<0.000000e+00> : vector<8x128xf32>
    %226 = tpu.matmul %224, %225, %cst_89 {dimension_numbers = #tpu.dot_dimension_numbers<[1], [0], [0], [1], [0, 0, 1, 1], [], []>} : vector<8x128xf32>, vector<128x128xf32>, vector<8x128xf32> -> vector<8x128xf32>
    %c0_90 = arith.constant 0 : index
    %c0_91 = arith.constant 0 : index
    %227 = vector.load %arg10[%c0_90, %c0_91] : memref<1x128xf32, #tpu.memory_space<vmem>>, vector<1x128xf32>
    %228 = vector.broadcast %227 : vector<1x128xf32> to vector<8x128xf32>
    %229 = arith.addf %226, %228 : vector<8x128xf32>
    %c0_92 = arith.constant 0 : index
    %c0_93 = arith.constant 0 : index
    %230 = vector.load %arg11[%c0_92, %c0_93] : memref<8x128xf32, #tpu.memory_space<vmem>>, vector<8x128xf32>
    tpu.vector_store %arg11[%c0_92, %c0_93], %229 {strides = array<i32>} : memref<8x128xf32, #tpu.memory_space<vmem>>, vector<8x128xf32>,
    return
  }
  func.func @transform_0(%arg0: i32) -> i32 {
    %c0_i32 = arith.constant 0 : i32
    %c0_i32_0 = arith.constant 0 : i32
    return %c0_i32 : i32
  }
  func.func @transform_1(%arg0: i32) -> (i32, i32) {
    %c0_i32 = arith.constant 0 : i32
    %c0_i32_0 = arith.constant 0 : i32
    return %arg0, %c0_i32 : i32, i32
  }
  func.func @transform_2(%arg0: i32) -> (i32, i32) {
    %c0_i32 = arith.constant 0 : i32
    %c0_i32_0 = arith.constant 0 : i32
    %c0_i32_1 = arith.constant 0 : i32
    return %c0_i32, %c0_i32_0 : i32, i32
  }
  func.func @transform_3(%arg0: i32) -> (i32, i32) {
    %c0_i32 = arith.constant 0 : i32
    %c0_i32_0 = arith.constant 0 : i32
    %c0_i32_1 = arith.constant 0 : i32
    return %c0_i32, %c0_i32_0 : i32, i32
  }
  func.func @transform_4(%arg0: i32) -> (i32, i32) {
    %c0_i32 = arith.constant 0 : i32
    %c0_i32_0 = arith.constant 0 : i32
    %c0_i32_1 = arith.constant 0 : i32
    return %c0_i32, %c0_i32_0 : i32, i32
  }
  func.func @transform_5(%arg0: i32) -> (i32, i32) {
    %c0_i32 = arith.constant 0 : i32
    %c0_i32_0 = arith.constant 0 : i32
    %c0_i32_1 = arith.constant 0 : i32
    return %c0_i32, %c0_i32_0 : i32, i32
  }
  func.func @transform_6(%arg0: i32) -> (i32, i32) {
    %c0_i32 = arith.constant 0 : i32
    %c0_i32_0 = arith.constant 0 : i32
    %c0_i32_1 = arith.constant 0 : i32
    return %c0_i32, %c0_i32_0 : i32, i32
  }
  func.func @transform_7(%arg0: i32) -> (i32, i32) {
    %c0_i32 = arith.constant 0 : i32
    %c0_i32_0 = arith.constant 0 : i32
    %c0_i32_1 = arith.constant 0 : i32
    return %c0_i32, %c0_i32_0 : i32, i32
  }
  func.func @transform_8(%arg0: i32) -> (i32, i32) {
    %c0_i32 = arith.constant 0 : i32
    %c0_i32_0 = arith.constant 0 : i32
    %c0_i32_1 = arith.constant 0 : i32
    return %c0_i32, %c0_i32_0 : i32, i32
  }
  func.func @transform_9(%arg0: i32) -> (i32, i32) {
    %c0_i32 = arith.constant 0 : i32
    %c0_i32_0 = arith.constant 0 : i32
    %c0_i32_1 = arith.constant 0 : i32
    return %c0_i32, %c0_i32_0 : i32, i32
  }
  func.func @transform_10(%arg0: i32) -> (i32, i32) {
    %c0_i32 = arith.constant 0 : i32
    %c0_i32_0 = arith.constant 0 : i32
    return %arg0, %c0_i32 : i32, i32
  }
}

</mosaic_0001>

<bundles_post_ra>
// kernel: euc_encoder_forward.1
= control target key start
LH: loop header
LB: loop body
LE: loop exit
PB: predicated region body
PF: predicated region fallthrough
CT: control target
= control target key end

     0   :  { %15 = vsyncpa [#allocation3], 0  ;;  %s1457_s13 = smov 0   ;;  %s1752_s0 = inlined_call_operand.vmem [shape: f32[2], index: 0, kind: input, shape index: {}]   ;;  %s1753_s1 = inlined_call_operand.vmem [shape: f32[16,128], index: 1, kind: input, shape index: {}]   ;;  %s1754_s2 = inlined_call_operand.vmem [shape: f32[128,128], index: 2, kind: input, shape index: {}]   ;;  %s1755_s3 = inlined_call_operand.vmem [shape: f32[1,128], index: 3, kind: input, shape index: {}]   ;;  %s1756_s4 = inlined_call_operand.vmem [shape: f32[128,128], index: 4, kind: input, shape index: {}]   ;;  %s1757_s5 = inlined_call_operand.vmem [shape: f32[1,128], index: 5, kind: input, shape index: {}]   ;;  %s1758_s6 = inlined_call_operand.vmem [shape: f32[128,128], index: 6, kind: input, shape index: {}]   ;;  %s1759_s7 = inlined_call_operand.vmem [shape: f32[1,128], index: 7, kind: input, shape index: {}]   ;;  %s1760_s8 = inlined_call_operand.vmem [shape: f32[128,128], index: 8, kind: input, shape index: {}]   ;;  %s1761_s9 = inlined_call_operand.vmem [shape: f32[1,128], index: 9, kind: input, shape index: {}]   ;;  %s1762_s10 = inlined_call_operand.vmem [shape: f32[16,128], index: 10, kind: output, shape index: {}]  }
   0x1 LB: > { %s1463_s14 = sadd.s32 4294967295, %s1396_s13   ;;  %p980_p0 = scmp.ge.s32.totalorder %s1396_s13, 1  ;;  %s1396_s13 = sphi %s1457_s13, %s21_s13  }
   0x2   : > { %p267_p1 = scmp.lt.s32.totalorder %s1396_s13, 3  ;;  %s280_s17 = sshll.u32 %s1752_s0, 4  ;;  %s281_s17 = int_to_ptr.vmem [resolvable:$true] %s280_s17 }
   0x3   : > { %p1309_p3 = scmp.eq.s32.totalorder %s1463_s14, 0  ;;  %s1371_s19 = scalar_lea.vmem %s281_s17, 16 }
   0x4   : > { %p1470_p2 = pnand %p980_p0, %p267_p1  ;;  %p1372_p6 = scmp.ne.s32.totalorder %s281_s17, %s1371_s19 }
   0x5   : > { %p1379_p10 = scmp.lt.s32.totalorder %s281_s17, %s281_s17  ;;  %p1380_p11 = scmp.lt.s32.totalorder %s1371_s19, %s1371_s19 }
   0x6   : > { %p1305_p4 = pneg %p1470_p2 }
   0x7   : > { %p1381_p12 = por %p1380_p11, %p1379_p10 }
   0x8   : > { %p1306_p5 = pnand %p1309_p3, %p1305_p4 }
   0xa   : > { %p1373_p7 = pneg %p1306_p5 }
   0xc   : > { %p1374_p8 = pnand %p1373_p7, %p1372_p6 }
   0xe   : > { %p1375_p9 = pneg %p1374_p8 }
  0x10   : > { %p1382_p13 = pnand %p1381_p12, %p1375_p9 }
  0x12   : > { %1385 = shalt.err (!%p1382_p13)
}
  0x13   : > { %s1398_s20 = smov [#allocation2]   ;;  %324 = sbr.rel (%p1470_p2) target bundleno = 2028 (0x7ec), region = 60 }
  0x14   : > { %1308 = dma.vmem_to_smem (!%p1306_p5), %s281_s17, 16, %s1398_s20, [#allocation3]  }
  0x1a   : > { %1391 = dma.done.wait (%p1309_p3), [#allocation3], 16  }
  0x1b   : > { %1393 = vsyncadd (%p1309_p3), [#allocation3], 4294967280 }
  0x1c   : > { %330 = sfence }
  0x1d   : > { %v393_v0 = vld [vmem:[%s1754_s2] sm:$0xff]  ;;  %v394_v1 = vld [vmem:[%s1754_s2 + $0x8] sm:$0xff]  ;;  %v395_v2 = vld [vmem:[%s1754_s2 + $0x10] sm:$0xff]  ;;  %v1399_v3 = vmov 0.0|0.0   ;;  %vm1400_vm0 = vmmov 0   ;;  %v1401_v6 = vmov 0.0  }
  0x1e   : > { %1205 = vmatprep.subr.bf16.mxu0 %v1399_v3  ;;  %v1206_v4 = vpack.c.bf16 %v394_v1, %v393_v0  ;;  %v396_v5 = vld [vmem:[%s1754_s2 + $0x18] sm:$0xff]  ;;  %1097 = vmatprep.mubr.msk.f32.mxu0 %vm1400_vm0, %v1401_v6  ;;  %p361_p0 = scmp.lt.s32.totalorder %s1463_s14, 1  ;;  %v397_v8 = vld [vmem:[%s1754_s2 + $0x20] sm:$0xff]  ;;  %v398_v9 = vld [vmem:[%s1754_s2 + $0x28] sm:$0xff]  ;;  %s381_s24 = sld [smem:[#allocation2]] }
  0x1f   : > { %1229 = vmatprep.subr.bf16.mxu1 %v1399_v3  ;;  %1132 = vmatprep.mubr.msk.f32.mxu1 %vm1400_vm0, %v1401_v6  ;;  %v1209_v7 = vpack.c.bf16 %v396_v5, %v395_v2  ;;  %v1212_v10 = vpack.c.bf16 %v398_v9, %v397_v8  ;;  %v399_v12 = vld [vmem:[%s1754_s2 + $0x30] sm:$0xff]  ;;  %v400_v13 = vld [vmem:[%s1754_s2 + $0x38] sm:$0xff]  ;;  %v401_v16 = vld [vmem:[%s1754_s2 + $0x40] sm:$0xff]  ;;  %s989_s25 = sld [smem:[#allocation2 + $0x1]] }
  0x20   : > { %1207 = vmatpush3.bf16.msra.mxu0 %v1206_v4  ;;  %s1765_s14 = smov (!%p361_p0, %s1463_s14), 1  ;;  %v1215_v15 = vpack.c.bf16 %v400_v13, %v399_v12  ;;  %v402_v17 = vld [vmem:[%s1754_s2 + $0x48] sm:$0xff]  ;;  %v403_v19 = vld [vmem:[%s1754_s2 + $0x50] sm:$0xff]  ;;  %v404_v20 = vld [vmem:[%s1754_s2 + $0x58] sm:$0xff] }
  0x21   : > { %1208 = vmatprep.subr.bf16.mxu0 %v1399_v3  ;;  %s985_s15 = sshll.u32 %s1765_s14, 3  ;;  %v1218_v18 = vpack.c.bf16 %v402_v17, %v401_v16  ;;  %v1221_v21 = vpack.c.bf16 %v404_v20, %v403_v19  ;;  %v405_v22 = vld [vmem:[%s1754_s2 + $0x60] sm:$0xff]  ;;  %v406_v23 = vld [vmem:[%s1754_s2 + $0x68] sm:$0xff]  ;;  %v407_v25 = vld [vmem:[%s1754_s2 + $0x70] sm:$0xff] }
  0x22   : > { %s364_s18 = scalar_lea.vmem %s1753_s1, %s985_s15  ;;  %v1224_v24 = vpack.c.bf16 %v406_v23, %v405_v22  ;;  %v408_v26 = vld [vmem:[%s1754_s2 + $0x78] sm:$0xff]  ;;  %v988_v0 = vld [vmem:[%s1755_s3] ss:$0 sm:$0xff]  ;;  %s368_s28 = scalar_lea.vmem %s1762_s10, %s985_s15 }
  0x23   : > { %v369_v11 = vld [vmem:[%s364_s18] sm:$0xff]  ;;  %v1227_v27 = vpack.c.bf16 %v408_v26, %v407_v25 }
  0x24   : > { %1210 = vmatpush3.bf16.msra.mxu0 %v1209_v7  ;;  %v370_v14 = vmul.f32 %v369_v11, %v369_v11  ;;  %v515_v7 = vstv %s381_s24  ;;  %v559_v26 = vld [vmem:[%s1756_s4] sm:$0xff] }
  0x25   : > { %1211 = vmatprep.subr.bf16.mxu0 %v1399_v3 }
  0x26   : > { %371 = vadd.xlane.f32.xlu0 %v370_v14 }
  0x28   : > { %1213 = vmatpush3.bf16.msra.mxu0 %v1212_v10 }
  0x29   : > { %1214 = vmatprep.subr.bf16.mxu0 %v1399_v3 }
  0x2c   : > { %1216 = vmatpush3.bf16.msra.mxu0 %v1215_v15 }
  0x2d   : > { %1217 = vmatprep.subr.bf16.mxu0 %v1399_v3 }
  0x30   : > { %1219 = vmatpush3.bf16.msra.mxu0 %v1218_v18 }
  0x31   : > { %1220 = vmatprep.subr.bf16.mxu0 %v1399_v3 }
  0x34   : > { %1222 = vmatpush3.bf16.msra.mxu0 %v1221_v21 }
  0x35   : > { %1223 = vmatprep.subr.bf16.mxu0 %v1399_v3 }
  0x38   : > { %1225 = vmatpush3.bf16.msra.mxu0 %v1224_v24 }
  0x39   : > { %1226 = vmatprep.subr.bf16.mxu0 %v1399_v3 }
  0x3c   : > { %1228 = vmatpush3.bf16.msra.mxu0 %v1227_v27  ;;  %v560_v27 = vld [vmem:[%s1756_s4 + $0x8] sm:$0xff] }
  0x3d   : > { %1253 = vmatprep.subr.bf16.mxu0 %v1399_v3 }
  0x3f   : > { %1098 = vmatmul.mubr.f32.vlgmr.msra.gmra.mrb[0].mxu0 %v369_v11 }
  0x40   : > { %1167 = vmatprep.mubr.msk.f32.mxu0 %vm1400_vm0, %v1401_v6 }
  0xb3   : > { %v372_v31 = vpop.xlane.xlu0 %371 }
  0xb4   : > { %v373_v32 = vmax.f32 %v372_v31, 1e-30 }
  0xb6   : > { %1323 = vrsqrt.f32 %v373_v32  ;;  %vm376_vm1 = vcmp.eq.f32.partialorder %v373_v32, inf  ;;  %v379_v35 = vand.u32 2147483648, %v373_v32  ;;  %vm378_vm2 = vcmp.eq.f32.partialorder %v373_v32, 0.0 }
  0xc0   : > { %v1324_v33 = vpop.eup %1323 }
  0xc1   : > { %v375_v34 = vmul.f32 %v1324_v33, %v373_v32  ;;  %v564_v33 = vld [vmem:[%s1756_s4 + $0x28] sm:$0xff] }
  0xc3   : > { %v377_v36 = vsel %vm376_vm1, %v373_v32, %v375_v34  ;;  %v563_v32 = vld [vmem:[%s1756_s4 + $0x20] sm:$0xff] }
  0xc4   : > { %v380_v37 = vsel %vm378_vm2, %v379_v35, %v377_v36  ;;  %v1236_v34 = vpack.c.bf16 %v564_v33, %v563_v32  ;;  %v565_v35 = vld [vmem:[%s1756_s4 + $0x30] sm:$0xff]  ;;  %v566_v36 = vld [vmem:[%s1756_s4 + $0x38] sm:$0xff]  ;;  %v681_v33 = vstv %s989_s25 }
  0xc5   : > { %v987_v38 = vclamps-f32 %v380_v37, 0.999999 }
  0xc7   : > { %v385_v39 = vsub.f32 1.0, %v987_v38  ;;  %v384_v40 = vadd.f32 1.0, %v987_v38  ;;  %v567_v38 = vld [vmem:[%s1756_s4 + $0x40] sm:$0xff] }
  0xc9   : > { %1325 = vrcp.f32 %v385_v39  ;;  %v568_v39 = vld [vmem:[%s1756_s4 + $0x48] sm:$0xff] }
  0xd3   : > { %v1326_v41 = vpop.eup %1325 }
  0xd4   : > { %v387_v42 = vmul.f32 %v1326_v41, %v384_v40  ;;  %v1242_v40 = vpack.c.bf16 %v568_v39, %v567_v38  ;;  %v569_v41 = vld [vmem:[%s1756_s4 + $0x50] sm:$0xff] }
  0xd6   : > { %1327 = vlog2.f32 %v387_v42  ;;  %v570_v42 = vld [vmem:[%s1756_s4 + $0x58] sm:$0xff] }
  0xd7   : > { %1329 = vrcp.f32 %v380_v37  ;;  %v1239_v37 = vpack.c.bf16 %v566_v36, %v565_v35 }
  0xe0   : > { %v1328_v45 = vpop.eup %1327 }
  0xe1   : > { %v389_v46 = vmul.f32 0.6931472, %v1328_v45  ;;  %v1330_v47 = vpop.eup %1329  ;;  %v572_v45 = vld [vmem:[%s1756_s4 + $0x68] sm:$0xff] }
  0xe3   : > { %v390_v48 = vmul.f32 0.5, %v389_v46 }
  0xe5   : > { %v392_v52 = vmul.f32 %v1330_v47, %v390_v48  ;;  %v573_v47 = vld [vmem:[%s1756_s4 + $0x70] sm:$0xff]  ;;  %v574_v48 = vld [vmem:[%s1756_s4 + $0x78] sm:$0xff] }
 0x112   : > { %v475_v28 = vpop.f32.mrb[0].mxu0 }
 0x113   : > { %v1099_v29 = vpop.f32.mrb[1].mxu0  ;;  %v479_v30 = vmul.f32 %v475_v28, %v475_v28 }
 0x114   : > { %v561_v29 = vld [vmem:[%s1756_s4 + $0x10] sm:$0xff] }
 0x115   : > { %480 = vadd.xlane.f32.xlu0 %v479_v30  ;;  %v562_v30 = vld [vmem:[%s1756_s4 + $0x18] sm:$0xff] }
 0x116   : > { %v1233_v31 = vpack.c.bf16 %v562_v30, %v561_v29 }
 0x1a2   : > { %v481_v43 = vpop.xlane.xlu0 %480 }
 0x1a3   : > { %v482_v44 = vmax.f32 %v481_v43, 1e-30  ;;  %v1245_v43 = vpack.c.bf16 %v570_v42, %v569_v41 }
 0x1a5   : > { %1331 = vrsqrt.f32 %v482_v44  ;;  %vm485_vm3 = vcmp.eq.f32.partialorder %v482_v44, inf  ;;  %v488_v51 = vand.u32 2147483648, %v482_v44  ;;  %vm487_vm4 = vcmp.eq.f32.partialorder %v482_v44, 0.0 }
 0x1af   : > { %v1332_v49 = vpop.eup %1331 }
 0x1b0   : > { %v484_v50 = vmul.f32 %v1332_v49, %v482_v44  ;;  %v1251_v49 = vpack.c.bf16 %v574_v48, %v573_v47 }
 0x1b2   : > { %v486_v53 = vsel %vm485_vm3, %v482_v44, %v484_v50  ;;  %v571_v44 = vld [vmem:[%s1756_s4 + $0x60] sm:$0xff] }
 0x1b3   : > { %v489_v54 = vsel %vm487_vm4, %v488_v51, %v486_v53  ;;  %v1248_v46 = vpack.c.bf16 %v572_v45, %v571_v44 }
 0x1b4   : > { %v490_v55 = vmul.f32 %v489_v54, %v392_v52 }
 0x1b6   : > { %1333 = vtanh.f32 %v490_v55 }
 0x1b7   : > { %1335 = vrcp.f32 %v490_v55 }
 0x1c0   : > { %v1334_v56 = vpop.eup %1333 }
 0x1c1   : > { %1337 = vrcp.f32 %v1334_v56  ;;  %v1336_v57 = vpop.eup %1335  ;;  %vm495_vm5 = vcmp.gt.f32.partialorder %v1334_v56, 0.99999  ;;  %v501_v4 = vmin.f32 %v1334_v56, 0.99999 }
 0x1c2   : > { %v493_v58 = vmul.f32 %v1336_v57, %v1334_v56 }
 0x1c3   : > { %v502_v5 = vmul.f32 %v501_v4, %v501_v4 }
 0x1c4   : > { %v494_v61 = vmul.f32 %v493_v58, %v392_v52 }
 0x1c5   : > { %v516_v10 = vmul.f32 %v515_v7, %v502_v5  ;;  %v526_v17 = vsub.f32 1.0, %v502_v5 }
 0x1cb   : > { %v1338_v59 = vpop.eup %1337 }
 0x1cc   : > { %v497_v60 = vmul.f32 0.99999, %v1338_v59 }
 0x1ce   : > { %v498_v62 = vsel %vm495_vm5, %v497_v60, 1.0 }
 0x1cf   : > { %v499_v63 = vmul.f32 %v498_v62, %v494_v61 }
 0x1d1   : > { %v500_v1 = vmul.f32 %v499_v63, %v475_v28  ;;  %v1230_v28 = vpack.c.bf16 %v560_v27, %v559_v26 }
 0x1d3   : > { %v510_v2 = vmul.f32 %v988_v0, %v500_v1  ;;  %1231 = vmatpush3.bf16.msra.mxu1 %v1230_v28  ;;  %v991_v28 = vld [vmem:[%s1757_s5] ss:$0 sm:$0xff] }
 0x1d4   : > { %1232 = vmatprep.subr.bf16.mxu1 %v1399_v3 }
 0x1d5   : > { %511 = vadd.xlane.f32.xlu1 %v510_v2 }
 0x1d7   : > { %1234 = vmatpush3.bf16.msra.mxu1 %v1233_v31 }
 0x1d8   : > { %1235 = vmatprep.subr.bf16.mxu1 %v1399_v3 }
 0x1db   : > { %1237 = vmatpush3.bf16.msra.mxu1 %v1236_v34 }
 0x1dc   : > { %1238 = vmatprep.subr.bf16.mxu1 %v1399_v3 }
 0x1df   : > { %1240 = vmatpush3.bf16.msra.mxu1 %v1239_v37 }
 0x1e0   : > { %1241 = vmatprep.subr.bf16.mxu1 %v1399_v3 }
 0x1e3   : > { %1243 = vmatpush3.bf16.msra.mxu1 %v1242_v40 }
 0x1e4   : > { %1244 = vmatprep.subr.bf16.mxu1 %v1399_v3 }
 0x1e7   : > { %1246 = vmatpush3.bf16.msra.mxu1 %v1245_v43 }
 0x1e8   : > { %1247 = vmatprep.subr.bf16.mxu1 %v1399_v3 }
 0x1eb   : > { %1249 = vmatpush3.bf16.msra.mxu1 %v1248_v46 }
 0x1ec   : > { %1250 = vmatprep.subr.bf16.mxu1 %v1399_v3 }
 0x1ef   : > { %1252 = vmatpush3.bf16.msra.mxu1 %v1251_v49 }
 0x1f0   : > { %1277 = vmatprep.subr.bf16.mxu1 %v1399_v3 }
 0x262   : > { %v512_v8 = vpop.xlane.xlu1 %511 }
 0x263   : > { %v513_v9 = vmul.f32 2.0, %v512_v8 }
 0x265   : > { %v514_v11 = vadd.f32 1.0, %v513_v9 }
 0x267   : > { %v517_v12 = vadd.f32 %v516_v10, %v514_v11  ;;  %v523_v19 = vadd.f32 %v515_v7, %v514_v11 }
 0x269   : > { %v518_v13 = vmax.f32 %v517_v12, 1e-15 }
 0x26b   : > { %1339 = vrcp.f32 %v518_v13 }
 0x275   : > { %v1340_v14 = vpop.eup %1339 }
 0x276   : > { %v520_v15 = vmul.f32 %v1340_v14, %v518_v13 }
 0x278   : > { %v521_v16 = vsub.f32 2.0, %v520_v15 }
 0x27a   : > { %v522_v18 = vmul.f32 %v1340_v14, %v521_v16 }
 0x27c   : > { %v524_v20 = vmul.f32 %v523_v19, %v522_v18  ;;  %v527_v21 = vmul.f32 %v526_v17, %v522_v18 }
 0x27e   : > { %v525_v22 = vmul.f32 %v524_v20, %v500_v1  ;;  %v528_v23 = vmul.f32 %v988_v0, %v527_v21 }
 0x280   : > { %v529_v24 = vadd.f32 %v528_v23, %v525_v22 }
 0x282   : > { %v530_v25 = vmul.f32 %v529_v24, %v529_v24 }
 0x284   : > { %531 = vadd.xlane.f32.xlu1 %v530_v25 }
 0x311   : > { %v532_v50 = vpop.xlane.xlu1 %531 }
 0x312   : > { %v533_v51 = vmax.f32 %v532_v50, 1e-30 }
 0x314   : > { %1341 = vrsqrt.f32 %v533_v51  ;;  %vm536_vm6 = vcmp.eq.f32.partialorder %v533_v51, inf  ;;  %v539_v54 = vand.u32 2147483648, %v533_v51  ;;  %vm538_vm7 = vcmp.eq.f32.partialorder %v533_v51, 0.0 }
 0x31e   : > { %v1342_v52 = vpop.eup %1341 }
 0x31f   : > { %v535_v53 = vmul.f32 %v1342_v52, %v533_v51  ;;  %v725_v52 = vld [vmem:[%s1758_s6] sm:$0xff] }
 0x321   : > { %v537_v55 = vsel %vm536_vm6, %v533_v51, %v535_v53  ;;  %v726_v53 = vld [vmem:[%s1758_s6 + $0x8] sm:$0xff] }
 0x322   : > { %v540_v56 = vsel %vm538_vm7, %v539_v54, %v537_v55  ;;  %v727_v54 = vld [vmem:[%s1758_s6 + $0x10] sm:$0xff]  ;;  %v1254_v55 = vpack.c.bf16 %v726_v53, %v725_v52 }
 0x323   : > { %1343 = vrcp.f32 %v540_v56  ;;  %vm541_vm8 = vcmp.gt.f32.partialorder %v540_v56, 0.99999  ;;  %v546_v0 = vmin.f32 %v540_v56, 0.99999  ;;  %v728_v56 = vld [vmem:[%s1758_s6 + $0x18] sm:$0xff] }
 0x324   : > { %1255 = vmatpush3.bf16.msra.mxu0 %v1254_v55 }
 0x325   : > { %v990_v1 = vclamps-f32 %v546_v0, 0.999999  ;;  %1256 = vmatprep.subr.bf16.mxu0 %v1399_v3 }
 0x327   : > { %v551_v2 = vsub.f32 1.0, %v990_v1  ;;  %v550_v5 = vadd.f32 1.0, %v990_v1  ;;  %v734_v1 = vld [vmem:[%s1758_s6 + $0x48] sm:$0xff] }
 0x329   : > { %1345 = vrcp.f32 %v551_v2 }
 0x32d   : > { %v1344_v57 = vpop.eup %1343 }
 0x32e   : > { %v543_v58 = vmul.f32 0.99999, %v1344_v57  ;;  %v1257_v57 = vpack.c.bf16 %v728_v56, %v727_v54 }
 0x330   : > { %v544_v59 = vsel %vm541_vm8, %v543_v58, 1.0  ;;  %v729_v58 = vld [vmem:[%s1758_s6 + $0x20] sm:$0xff]  ;;  %1258 = vmatpush3.bf16.msra.mxu0 %v1257_v57  ;;  %v833_v57 = vld [vmem:[%s1760_s8 + $0x70] sm:$0xff] }
 0x331   : > { %v545_v60 = vmul.f32 %v544_v59, %v529_v24  ;;  %v730_v59 = vld [vmem:[%s1758_s6 + $0x28] sm:$0xff]  ;;  %1259 = vmatprep.subr.bf16.mxu0 %v1399_v3 }
 0x333   : > { %1133 = vmatmul.mubr.f32.vlgmr.msra.gmra.mrb[0].mxu1 %v545_v60  ;;  %v1346_v4 = vpop.eup %1345  ;;  %v1260_v60 = vpack.c.bf16 %v730_v59, %v729_v58  ;;  %v834_v58 = vld [vmem:[%s1760_s8 + $0x78] sm:$0xff] }
 0x334   : > { %1202 = vmatprep.mubr.msk.f32.mxu1 %vm1400_vm0, %v1401_v6  ;;  %v553_v7 = vmul.f32 %v1346_v4, %v550_v5  ;;  %v735_v4 = vld [vmem:[%s1758_s6 + $0x50] sm:$0xff]  ;;  %v736_v5 = vld [vmem:[%s1758_s6 + $0x58] sm:$0xff]  ;;  %v1299_v59 = vpack.c.bf16 %v834_v58, %v833_v57 }
 0x335   : > { %1261 = vmatpush3.bf16.msra.mxu0 %v1260_v60  ;;  %v993_v60 = vld [vmem:[%s1759_s7] ss:$0 sm:$0xff] }
 0x336   : > { %1347 = vlog2.f32 %v553_v7  ;;  %1262 = vmatprep.subr.bf16.mxu0 %v1399_v3  ;;  %v1269_v7 = vpack.c.bf16 %v736_v5, %v735_v4 }
 0x340   : > { %v1348_v10 = vpop.eup %1347 }
 0x341   : > { %v555_v11 = vmul.f32 0.6931472, %v1348_v10 }
 0x343   : > { %v556_v12 = vmul.f32 0.5, %v555_v11  ;;  %v739_v11 = vld [vmem:[%s1758_s6 + $0x70] sm:$0xff] }
 0x406   : > { %v641_v61 = vpop.f32.mrb[0].mxu1 }
 0x407   : > { %v1134_v62 = vpop.f32.mrb[1].mxu1  ;;  %v645_v63 = vmul.f32 %v641_v61, %v641_v61 }
 0x408   : > { %v732_v62 = vld [vmem:[%s1758_s6 + $0x38] sm:$0xff] }
 0x409   : > { %646 = vadd.xlane.f32.xlu0 %v645_v63 }
 0x496   : > { %v647_v8 = vpop.xlane.xlu0 %646 }
 0x497   : > { %v648_v9 = vmax.f32 %v647_v8, 1e-30  ;;  %v737_v8 = vld [vmem:[%s1758_s6 + $0x60] sm:$0xff] }
 0x499   : > { %1349 = vrsqrt.f32 %v648_v9  ;;  %vm651_vm9 = vcmp.eq.f32.partialorder %v648_v9, inf  ;;  %v654_v15 = vand.u32 2147483648, %v648_v9  ;;  %vm653_vm10 = vcmp.eq.f32.partialorder %v648_v9, 0.0 }
 0x49a   : > { %1351 = vrcp.f32 %v546_v0  ;;  %v733_v0 = vld [vmem:[%s1758_s6 + $0x40] sm:$0xff] }
 0x49b   : > { %v1266_v2 = vpack.c.bf16 %v734_v1, %v733_v0  ;;  %v994_v0 = vld [vmem:[%s1761_s9] ss:$0 sm:$0xff] }
 0x4a3   : > { %v1350_v6 = vpop.eup %1349 }
 0x4a4   : > { %v650_v13 = vmul.f32 %v1350_v6, %v648_v9  ;;  %v1352_v14 = vpop.eup %1351 }
 0x4a5   : > { %v558_v16 = vmul.f32 %v1352_v14, %v556_v12  ;;  %v740_v12 = vld [vmem:[%s1758_s6 + $0x78] sm:$0xff]  ;;  %v820_v14 = vld [vmem:[%s1760_s8 + $0x8] sm:$0xff] }
 0x4a6   : > { %v652_v17 = vsel %vm651_vm9, %v648_v9, %v650_v13  ;;  %v738_v9 = vld [vmem:[%s1758_s6 + $0x68] sm:$0xff]  ;;  %v1275_v6 = vpack.c.bf16 %v740_v12, %v739_v11  ;;  %v819_v13 = vld [vmem:[%s1760_s8] sm:$0xff] }
 0x4a7   : > { %v655_v18 = vsel %vm653_vm10, %v654_v15, %v652_v17  ;;  %v1272_v10 = vpack.c.bf16 %v738_v9, %v737_v8  ;;  %v821_v15 = vld [vmem:[%s1760_s8 + $0x10] sm:$0xff]  ;;  %v822_v17 = vld [vmem:[%s1760_s8 + $0x18] sm:$0xff] }
 0x4a8   : > { %v656_v19 = vmul.f32 %v655_v18, %v558_v16  ;;  %v1281_v18 = vpack.c.bf16 %v822_v17, %v821_v15 }
 0x4aa   : > { %1353 = vtanh.f32 %v656_v19 }
 0x4ab   : > { %1355 = vrcp.f32 %v656_v19  ;;  %v823_v19 = vld [vmem:[%s1760_s8 + $0x20] sm:$0xff] }
 0x4b4   : > { %v1354_v20 = vpop.eup %1353 }
 0x4b5   : > { %1357 = vrcp.f32 %v1354_v20  ;;  %v1356_v21 = vpop.eup %1355  ;;  %vm661_vm11 = vcmp.gt.f32.partialorder %v1354_v20, 0.99999  ;;  %v667_v31 = vmin.f32 %v1354_v20, 0.99999 }
 0x4b6   : > { %v659_v22 = vmul.f32 %v1356_v21, %v1354_v20  ;;  %v824_v20 = vld [vmem:[%s1760_s8 + $0x28] sm:$0xff] }
 0x4b7   : > { %v668_v32 = vmul.f32 %v667_v31, %v667_v31  ;;  %v1284_v21 = vpack.c.bf16 %v824_v20, %v823_v19  ;;  %v831_v31 = vld [vmem:[%s1760_s8 + $0x60] sm:$0xff] }
 0x4b8   : > { %v660_v25 = vmul.f32 %v659_v22, %v558_v16  ;;  %v1278_v16 = vpack.c.bf16 %v820_v14, %v819_v13  ;;  %v825_v22 = vld [vmem:[%s1760_s8 + $0x30] sm:$0xff] }
 0x4b9   : > { %v682_v36 = vmul.f32 %v681_v33, %v668_v32  ;;  %v692_v43 = vsub.f32 1.0, %v668_v32  ;;  %v832_v32 = vld [vmem:[%s1760_s8 + $0x68] sm:$0xff] }
 0x4ba   : > { %1279 = vmatpush3.bf16.msra.mxu1 %v1278_v16 }
 0x4bb   : > { %1280 = vmatprep.subr.bf16.mxu1 %v1399_v3 }
 0x4be   : > { %1282 = vmatpush3.bf16.msra.mxu1 %v1281_v18 }
 0x4bf   : > { %v1358_v23 = vpop.eup %1357  ;;  %1283 = vmatprep.subr.bf16.mxu1 %v1399_v3 }
 0x4c0   : > { %v663_v24 = vmul.f32 0.99999, %v1358_v23  ;;  %v826_v23 = vld [vmem:[%s1760_s8 + $0x38] sm:$0xff] }
 0x4c2   : > { %v664_v26 = vsel %vm661_vm11, %v663_v24, 1.0  ;;  %1285 = vmatpush3.bf16.msra.mxu1 %v1284_v21  ;;  %v1287_v24 = vpack.c.bf16 %v826_v23, %v825_v22 }
 0x4c3   : > { %v665_v27 = vmul.f32 %v664_v26, %v660_v25  ;;  %1286 = vmatprep.subr.bf16.mxu1 %v1399_v3  ;;  %v827_v25 = vld [vmem:[%s1760_s8 + $0x40] sm:$0xff]  ;;  %v828_v26 = vld [vmem:[%s1760_s8 + $0x48] sm:$0xff] }
 0x4c5   : > { %v666_v29 = vmul.f32 %v665_v27, %v641_v61  ;;  %v731_v61 = vld [vmem:[%s1758_s6 + $0x30] sm:$0xff]  ;;  %v1290_v27 = vpack.c.bf16 %v828_v26, %v827_v25 }
 0x4c6   : > { %v1263_v63 = vpack.c.bf16 %v732_v62, %v731_v61  ;;  %1288 = vmatpush3.bf16.msra.mxu1 %v1287_v24 }
 0x4c7   : > { %v676_v30 = vmul.f32 %v991_v28, %v666_v29  ;;  %1289 = vmatprep.subr.bf16.mxu1 %v1399_v3 }
 0x4c8   : > { %1264 = vmatpush3.bf16.msra.mxu0 %v1263_v63 }
 0x4c9   : > { %677 = vadd.xlane.f32.xlu1 %v676_v30  ;;  %1265 = vmatprep.subr.bf16.mxu0 %v1399_v3 }
 0x4ca   : > { %1291 = vmatpush3.bf16.msra.mxu1 %v1290_v27 }
 0x4cb   : > { %1292 = vmatprep.subr.bf16.mxu1 %v1399_v3 }
 0x4cc   : > { %1267 = vmatpush3.bf16.msra.mxu0 %v1266_v2 }
 0x4cd   : > { %1268 = vmatprep.subr.bf16.mxu0 %v1399_v3 }
 0x4d0   : > { %1270 = vmatpush3.bf16.msra.mxu0 %v1269_v7 }
 0x4d1   : > { %1271 = vmatprep.subr.bf16.mxu0 %v1399_v3 }
 0x4d4   : > { %1273 = vmatpush3.bf16.msra.mxu0 %v1272_v10 }
 0x4d5   : > { %1274 = vmatprep.subr.bf16.mxu0 %v1399_v3 }
 0x4d8   : > { %1276 = vmatpush3.bf16.msra.mxu0 %v1275_v6 }
 0x556   : > { %v678_v34 = vpop.xlane.xlu1 %677 }
 0x557   : > { %v679_v35 = vmul.f32 2.0, %v678_v34 }
 0x559   : > { %v680_v37 = vadd.f32 1.0, %v679_v35 }
 0x55b   : > { %v683_v38 = vadd.f32 %v682_v36, %v680_v37  ;;  %v689_v45 = vadd.f32 %v681_v33, %v680_v37  ;;  %v1296_v33 = vpack.c.bf16 %v832_v32, %v831_v31 }
 0x55d   : > { %v684_v39 = vmax.f32 %v683_v38, 1e-15 }
 0x55f   : > { %1359 = vrcp.f32 %v684_v39 }
 0x569   : > { %v1360_v40 = vpop.eup %1359 }
 0x56a   : > { %v686_v41 = vmul.f32 %v1360_v40, %v684_v39 }
 0x56c   : > { %v687_v42 = vsub.f32 2.0, %v686_v41 }
 0x56e   : > { %v688_v44 = vmul.f32 %v1360_v40, %v687_v42 }
 0x570   : > { %v690_v46 = vmul.f32 %v689_v45, %v688_v44  ;;  %v693_v47 = vmul.f32 %v692_v43, %v688_v44 }
 0x572   : > { %v691_v48 = vmul.f32 %v690_v46, %v666_v29  ;;  %v694_v49 = vmul.f32 %v991_v28, %v693_v47  ;;  %v829_v28 = vld [vmem:[%s1760_s8 + $0x50] sm:$0xff]  ;;  %v830_v29 = vld [vmem:[%s1760_s8 + $0x58] sm:$0xff] }
 0x573   : > { %v1293_v30 = vpack.c.bf16 %v830_v29, %v829_v28 }
 0x574   : > { %v1623_v50 = vadd.f32 %v694_v49, %v691_v48 }
 0x575   : > { %1294 = vmatpush3.bf16.msra.mxu1 %v1293_v30 }
 0x576   : > { %v696_v51 = vmul.f32 %v1623_v50, %v1623_v50  ;;  %1295 = vmatprep.subr.bf16.mxu1 %v1399_v3 }
 0x578   : > { %697 = vadd.xlane.f32.xlu0 %v696_v51 }
 0x579   : > { %1297 = vmatpush3.bf16.msra.mxu1 %v1296_v33 }
 0x57a   : > { %1298 = vmatprep.subr.bf16.mxu1 %v1399_v3 }
 0x57d   : > { %1300 = vmatpush3.bf16.msra.mxu1 %v1299_v59 }
 0x605   : > { %v698_v34 = vpop.xlane.xlu0 %697 }
 0x606   : > { %v699_v35 = vmax.f32 %v698_v34, 1e-30 }
 0x608   : > { %1361 = vrsqrt.f32 %v699_v35  ;;  %vm702_vm12 = vcmp.eq.f32.partialorder %v699_v35, inf  ;;  %v705_v38 = vand.u32 2147483648, %v699_v35  ;;  %vm704_vm13 = vcmp.eq.f32.partialorder %v699_v35, 0.0 }
 0x612   : > { %v1362_v36 = vpop.eup %1361 }
 0x613   : > { %v701_v37 = vmul.f32 %v1362_v36, %v699_v35 }
 0x615   : > { %v703_v39 = vsel %vm702_vm12, %v699_v35, %v701_v37 }
 0x616   : > { %v706_v40 = vsel %vm704_vm13, %v705_v38, %v703_v39 }
 0x617   : > { %v712_v41 = vmin.f32 %v706_v40, 0.99999  ;;  %vm707_vm14 = vcmp.gt.f32.partialorder %v706_v40, 0.99999 }
 0x619   : > { %v992_v42 = vclamps-f32 %v712_v41, 0.999999 }
 0x61b   : > { %v716_v43 = vsub.f32 1.0, %v992_v42  ;;  %v715_v44 = vadd.f32 1.0, %v992_v42 }
 0x61d   : > { %1363 = vrcp.f32 %v716_v43 }
 0x61e   : > { %1365 = vrcp.f32 %v706_v40 }
 0x627   : > { %v1364_v45 = vpop.eup %1363 }
 0x628   : > { %v718_v46 = vmul.f32 %v1364_v45, %v715_v44  ;;  %v1366_v3 = vpop.eup %1365 }
 0x629   : > { %v709_v47 = vmul.f32 0.99999, %v1366_v3 }
 0x62a   : > { %1367 = vlog2.f32 %v718_v46 }
 0x62b   : > { %1369 = vrcp.f32 %v712_v41  ;;  %v710_v51 = vsel %vm707_vm14, %v709_v47, 1.0 }
 0x62c   : > { %v711_v54 = vmul.f32 %v710_v51, %v1623_v50 }
 0x634   : > { %v1368_v48 = vpop.eup %1367 }
 0x635   : > { %v720_v49 = vmul.f32 0.6931472, %v1368_v48  ;;  %v1370_v53 = vpop.eup %1369 }
 0x637   : > { %v721_v52 = vmul.f32 0.5, %v720_v49 }
 0x639   : > { %v723_v55 = vmul.f32 %v1370_v53, %v721_v52 }
 0x63b   : > { %v724_v56 = vmul.f32 %v723_v55, %v711_v54 }
 0x63d   : > { %1168 = vmatmul.mubr.f32.vlgmr.msra.gmra.mrb[2].mxu0 %v724_v56 }
 0x710   : > { %v814_v61 = vpop.f32.mrb[2].mxu0 }
 0x711   : > { %v815_v62 = vadd.f32 %v993_v60, %v814_v61  ;;  %v1169_v50 = vpop.f32.mrb[3].mxu0 }
 0x713   : > { %v818_v63 = vmax.f32 %v815_v62, 0.0 }
 0x715   : > { %1203 = vmatmul.mubr.f32.vlgmr.msra.gmra.mrb[2].mxu1 %v818_v63 }
 0x7e8   : > { %v908_v1 = vpop.f32.mrb[2].mxu1 }
 0x7e9   : > { %v909_v2 = vadd.f32 %v994_v0, %v908_v1  ;;  %v1204_v4 = vpop.f32.mrb[3].mxu1 }
 0x7eb   : > { %912 = vst [vmem:[%s368_s28] sm:$0xff] %v909_v2 }
 0x7ec PF: > { %s21_s13 = sadd.s32 1, %s1396_s13  }
 0x7ed   : > { %p18_p1 = scmp.ge.s32.totalorder %s21_s13, 4  }
 0x7ef   :  { %20 = sbr.rel (!%p18_p1) target bundleno = 1 (0x1), region = 95 }
 0x7f6   :  { %932 = vsyncpa [#allocation3], 1 }
 0x7f7   :  { %934 = vsyncpa [#allocation3 + $0x1], 1 }

</bundles_post_ra>
